<compile_context>
chip_gen: v6e
topology: v6e:2x2x1
jax: 0.10.0
libtpu: 0.0.40
codegen_flags: <defaults>
</compile_context>

<pallas_src>
import functools

import jax
import jax.numpy as jnp
from jax.experimental import pallas as pl
from jax.experimental.pallas import tpu as pltpu

LANE = 128      # TPU lane width  (last dim)
SUBLANE = 8     # TPU sublane width (second-to-last dim)


def _round_up(x, m):
    return (x + m - 1) // m * m


# ----------------------------------------------------------------------------
# Fused kernel: chain of (matmul + bias) layers, everything resident in VMEM.
# refs = (w1, b1, w2, b2, ..., wn, bn, out)
# ----------------------------------------------------------------------------
def _fused_mlp_kernel(x_ref, *refs):
    o_ref = refs[-1]
    wb_refs = refs[:-1]
    h = x_ref[...]
    for i in range(0, len(wb_refs), 2):
        w = wb_refs[i][...]
        b = wb_refs[i + 1][...]
        # MXU matmul with f32 accumulation; intermediates stay in vregs.
        h = jnp.dot(h, w, preferred_element_type=jnp.float32) + b
    o_ref[...] = h.astype(o_ref.dtype)


# ----------------------------------------------------------------------------
# Parameter construction (matches the PyTorch module's layer shapes) + padding
# ----------------------------------------------------------------------------
def init_autoencoder_params(key, input_dim, latent_dims):
    """Deterministic params: encoder dims then decoder dims, like the module."""
    enc_dims = list(zip([input_dim] + latent_dims[:-1], latent_dims))
    rev = latent_dims[::-1]
    dec_dims = list(zip(rev, rev[1:] + [input_dim]))
    params = []
    for (in_c, out_c) in enc_dims + dec_dims:
        key, kw, kb = jax.random.split(key, 3)
        bound = 1.0 / jnp.sqrt(in_c)
        w = jax.random.uniform(kw, (in_c, out_c), jnp.float32, -bound, bound)
        b = jax.random.uniform(kb, (out_c,), jnp.float32, -bound, bound)
        params.append((w, b))
    return params


def pad_params(params):
    """Zero-pad every (w, b) to (LANE, LANE) / (1, LANE) once, host-side.

    Zero padding keeps the math exact: padded activation columns are always 0
    and padded weight rows/cols are 0, so the first `out_c` columns of each
    layer's output equal the unpadded computation.
    """
    padded = []
    for w, b in params:
        in_c, out_c = w.shape
        wp = jnp.zeros((LANE, LANE), w.dtype).at[:in_c, :out_c].set(w)
        bp = jnp.zeros((1, LANE), b.dtype).at[0, :out_c].set(b)
        padded.append((wp, bp))
    return padded


# ----------------------------------------------------------------------------
# Fused forward pass (single pallas_call), jitted.
# ----------------------------------------------------------------------------
@functools.partial(jax.jit, static_argnames=("input_dim",))
def autoencoder_forward(x, padded_params, *, input_dim):
    B, D = x.shape

    # Batch tile: full (rounded-up) batch for small B, 128-row tiles otherwise.
    tm = LANE if B >= LANE else _round_up(max(B, SUBLANE), SUBLANE)
    Bp = _round_up(B, tm)

    # Lane-dense, sublane-aligned input (zero padded).
    xp = jnp.zeros((Bp, LANE), x.dtype).at[:B, :D].set(x)

    flat_wb = []
    in_specs = [pl.BlockSpec((tm, LANE), lambda i: (i, 0))]
    for w, b in padded_params:
        flat_wb.append(w)
        flat_wb.append(b)
        in_specs.append(pl.BlockSpec(w.shape, lambda i: (0, 0)))
        in_specs.append(pl.BlockSpec(b.shape, lambda i: (0, 0)))

    out = pl.pallas_call(
        _fused_mlp_kernel,
        out_shape=jax.ShapeDtypeStruct((Bp, LANE), x.dtype),
        grid=(Bp // tm,),
        in_specs=in_specs,
        out_specs=pl.BlockSpec((tm, LANE), lambda i: (i, 0)),
        compiler_params=pltpu.CompilerParams(
            dimension_semantics=("parallel",),  # megacore-shardable on v7x
        ),
    )(xp, *flat_wb)

    return out[:B, :input_dim]


if __name__ == "__main__":
    key = jax.random.PRNGKey(0)
    input_dim = 64
    latent_dims = [32, 16]
    batch = 8

    kx, kp = jax.random.split(key)
    x = jax.random.normal(kx, (batch, input_dim), jnp.float32)
    params = init_autoencoder_params(kp, input_dim, latent_dims)
    padded_params = pad_params(params)

    out = autoencoder_forward(x, padded_params, input_dim=input_dim)
    out = jax.block_until_ready(out)

    # Reference check in plain JAX (unpadded weights).
    ref = x
    for w, b in params:
        ref = ref @ w + b
    assert out.shape == (batch, input_dim)
    assert jnp.allclose(out, ref, atol=1e-4, rtol=1e-4)

    print("KERNEL_OK")
</pallas_src>

<mosaic_0001>
module attributes {stable_mosaic.version = 11 : i64} {
  func.func @_fused_mlp_kernel(%arg0: i32, %arg1: memref<8x128xf32, #tpu.memory_space<vmem>>, %arg2: memref<128x128xf32, #tpu.memory_space<vmem>>, %arg3: memref<1x128xf32, #tpu.memory_space<vmem>>, %arg4: memref<128x128xf32, #tpu.memory_space<vmem>>, %arg5: memref<1x128xf32, #tpu.memory_space<vmem>>, %arg6: memref<128x128xf32, #tpu.memory_space<vmem>>, %arg7: memref<1x128xf32, #tpu.memory_space<vmem>>, %arg8: memref<128x128xf32, #tpu.memory_space<vmem>>, %arg9: memref<1x128xf32, #tpu.memory_space<vmem>>, %arg10: memref<8x128xf32, #tpu.memory_space<vmem>>) attributes {dimension_semantics = [#tpu.dimension_semantics<parallel>], iteration_bounds = array<i64: 1>, scalar_prefetch = 0 : i64, scratch_operands = 0 : i64, tpu.core_type = #tpu.core_type<tc>, window_params = [{transform_indices = @transform_0, window_bounds = array<i64: 8, 128>}, {pipeline_mode = #tpu.pipeline_mode<synchronous>, transform_indices = @transform_1, window_bounds = array<i64: 128, 128>}, {pipeline_mode = #tpu.pipeline_mode<synchronous>, transform_indices = @transform_2, window_bounds = array<i64: 1, 128>}, {pipeline_mode = #tpu.pipeline_mode<synchronous>, transform_indices = @transform_3, window_bounds = array<i64: 128, 128>}, {pipeline_mode = #tpu.pipeline_mode<synchronous>, transform_indices = @transform_4, window_bounds = array<i64: 1, 128>}, {pipeline_mode = #tpu.pipeline_mode<synchronous>, transform_indices = @transform_5, window_bounds = array<i64: 128, 128>}, {pipeline_mode = #tpu.pipeline_mode<synchronous>, transform_indices = @transform_6, window_bounds = array<i64: 1, 128>}, {pipeline_mode = #tpu.pipeline_mode<synchronous>, transform_indices = @transform_7, window_bounds = array<i64: 128, 128>}, {pipeline_mode = #tpu.pipeline_mode<synchronous>, transform_indices = @transform_8, window_bounds = array<i64: 1, 128>}, {transform_indices = @transform_9, window_bounds = array<i64: 8, 128>}]} {
    %c0 = arith.constant 0 : index
    %c0_0 = arith.constant 0 : index
    %0 = vector.load %arg1[%c0, %c0_0] : memref<8x128xf32, #tpu.memory_space<vmem>>, vector<8x128xf32>
    %c0_1 = arith.constant 0 : index
    %c0_2 = arith.constant 0 : index
    %1 = vector.load %arg2[%c0_1, %c0_2] : memref<128x128xf32, #tpu.memory_space<vmem>>, vector<128x128xf32>
    %c0_3 = arith.constant 0 : index
    %c0_4 = arith.constant 0 : index
    %2 = vector.load %arg3[%c0_3, %c0_4] : memref<1x128xf32, #tpu.memory_space<vmem>>, vector<1x128xf32>
    %cst = arith.constant dense<0.000000e+00> : vector<8x128xf32>
    %3 = tpu.matmul %0, %1, %cst {dimension_numbers = #tpu.dot_dimension_numbers<[1], [0], [0], [1], [0, 0, 1, 1], [], []>} : vector<8x128xf32>, vector<128x128xf32>, vector<8x128xf32> -> vector<8x128xf32>
    %4 = vector.broadcast %2 : vector<1x128xf32> to vector<8x128xf32>
    %5 = arith.addf %3, %4 : vector<8x128xf32>
    %c0_5 = arith.constant 0 : index
    %c0_6 = arith.constant 0 : index
    %6 = vector.load %arg4[%c0_5, %c0_6] : memref<128x128xf32, #tpu.memory_space<vmem>>, vector<128x128xf32>
    %c0_7 = arith.constant 0 : index
    %c0_8 = arith.constant 0 : index
    %7 = vector.load %arg5[%c0_7, %c0_8] : memref<1x128xf32, #tpu.memory_space<vmem>>, vector<1x128xf32>
    %cst_9 = arith.constant dense<0.000000e+00> : vector<8x128xf32>
    %8 = tpu.matmul %5, %6, %cst_9 {dimension_numbers = #tpu.dot_dimension_numbers<[1], [0], [0], [1], [0, 0, 1, 1], [], []>} : vector<8x128xf32>, vector<128x128xf32>, vector<8x128xf32> -> vector<8x128xf32>
    %9 = vector.broadcast %7 : vector<1x128xf32> to vector<8x128xf32>
    %10 = arith.addf %8, %9 : vector<8x128xf32>
    %c0_10 = arith.constant 0 : index
    %c0_11 = arith.constant 0 : index
    %11 = vector.load %arg6[%c0_10, %c0_11] : memref<128x128xf32, #tpu.memory_space<vmem>>, vector<128x128xf32>
    %c0_12 = arith.constant 0 : index
    %c0_13 = arith.constant 0 : index
    %12 = vector.load %arg7[%c0_12, %c0_13] : memref<1x128xf32, #tpu.memory_space<vmem>>, vector<1x128xf32>
    %cst_14 = arith.constant dense<0.000000e+00> : vector<8x128xf32>
    %13 = tpu.matmul %10, %11, %cst_14 {dimension_numbers = #tpu.dot_dimension_numbers<[1], [0], [0], [1], [0, 0, 1, 1], [], []>} : vector<8x128xf32>, vector<128x128xf32>, vector<8x128xf32> -> vector<8x128xf32>
    %14 = vector.broadcast %12 : vector<1x128xf32> to vector<8x128xf32>
    %15 = arith.addf %13, %14 : vector<8x128xf32>
    %c0_15 = arith.constant 0 : index
    %c0_16 = arith.constant 0 : index
    %16 = vector.load %arg8[%c0_15, %c0_16] : memref<128x128xf32, #tpu.memory_space<vmem>>, vector<128x128xf32>
    %c0_17 = arith.constant 0 : index
    %c0_18 = arith.constant 0 : index
    %17 = vector.load %arg9[%c0_17, %c0_18] : memref<1x128xf32, #tpu.memory_space<vmem>>, vector<1x128xf32>
    %cst_19 = arith.constant dense<0.000000e+00> : vector<8x128xf32>
    %18 = tpu.matmul %15, %16, %cst_19 {dimension_numbers = #tpu.dot_dimension_numbers<[1], [0], [0], [1], [0, 0, 1, 1], [], []>} : vector<8x128xf32>, vector<128x128xf32>, vector<8x128xf32> -> vector<8x128xf32>
    %19 = vector.broadcast %17 : vector<1x128xf32> to vector<8x128xf32>
    %20 = arith.addf %18, %19 : vector<8x128xf32>
    %c0_20 = arith.constant 0 : index
    %c0_21 = arith.constant 0 : index
    %21 = vector.load %arg10[%c0_20, %c0_21] : memref<8x128xf32, #tpu.memory_space<vmem>>, vector<8x128xf32>
    tpu.vector_store %arg10[%c0_20, %c0_21], %20 {strides = array<i32>} : memref<8x128xf32, #tpu.memory_space<vmem>>, vector<8x128xf32>,
    return
  }
  func.func @transform_0(%arg0: i32) -> (i32, i32) {
    %c0_i32 = arith.constant 0 : i32
    %c0_i32_0 = arith.constant 0 : i32
    return %arg0, %c0_i32 : i32, i32
  }
  func.func @transform_1(%arg0: i32) -> (i32, i32) {
    %c0_i32 = arith.constant 0 : i32
    %c0_i32_0 = arith.constant 0 : i32
    %c0_i32_1 = arith.constant 0 : i32
    return %c0_i32, %c0_i32_0 : i32, i32
  }
  func.func @transform_2(%arg0: i32) -> (i32, i32) {
    %c0_i32 = arith.constant 0 : i32
    %c0_i32_0 = arith.constant 0 : i32
    %c0_i32_1 = arith.constant 0 : i32
    return %c0_i32, %c0_i32_0 : i32, i32
  }
  func.func @transform_3(%arg0: i32) -> (i32, i32) {
    %c0_i32 = arith.constant 0 : i32
    %c0_i32_0 = arith.constant 0 : i32
    %c0_i32_1 = arith.constant 0 : i32
    return %c0_i32, %c0_i32_0 : i32, i32
  }
  func.func @transform_4(%arg0: i32) -> (i32, i32) {
    %c0_i32 = arith.constant 0 : i32
    %c0_i32_0 = arith.constant 0 : i32
    %c0_i32_1 = arith.constant 0 : i32
    return %c0_i32, %c0_i32_0 : i32, i32
  }
  func.func @transform_5(%arg0: i32) -> (i32, i32) {
    %c0_i32 = arith.constant 0 : i32
    %c0_i32_0 = arith.constant 0 : i32
    %c0_i32_1 = arith.constant 0 : i32
    return %c0_i32, %c0_i32_0 : i32, i32
  }
  func.func @transform_6(%arg0: i32) -> (i32, i32) {
    %c0_i32 = arith.constant 0 : i32
    %c0_i32_0 = arith.constant 0 : i32
    %c0_i32_1 = arith.constant 0 : i32
    return %c0_i32, %c0_i32_0 : i32, i32
  }
  func.func @transform_7(%arg0: i32) -> (i32, i32) {
    %c0_i32 = arith.constant 0 : i32
    %c0_i32_0 = arith.constant 0 : i32
    %c0_i32_1 = arith.constant 0 : i32
    return %c0_i32, %c0_i32_0 : i32, i32
  }
  func.func @transform_8(%arg0: i32) -> (i32, i32) {
    %c0_i32 = arith.constant 0 : i32
    %c0_i32_0 = arith.constant 0 : i32
    %c0_i32_1 = arith.constant 0 : i32
    return %c0_i32, %c0_i32_0 : i32, i32
  }
  func.func @transform_9(%arg0: i32) -> (i32, i32) {
    %c0_i32 = arith.constant 0 : i32
    %c0_i32_0 = arith.constant 0 : i32
    return %arg0, %c0_i32 : i32, i32
  }
}

</mosaic_0001>

<bundles_post_ra>
// kernel: autoencoder_forward.1
= control target key start
LH: loop header
LB: loop body
LE: loop exit
PB: predicated region body
PF: predicated region fallthrough
CT: control target
= control target key end

     0   :  { %14 = vsyncpa [#allocation3], 0  ;;  %s981_s0 = inlined_call_operand.vmem [shape: f32[8,128], index: 0, kind: input, shape index: {}]   ;;  %s982_s1 = inlined_call_operand.hbm [shape: f32[128,128], index: 1, kind: input, shape index: {}]   ;;  %s983_s2 = inlined_call_operand.vmem [shape: f32[1,128], index: 2, kind: input, shape index: {}]   ;;  %s984_s3 = inlined_call_operand.hbm [shape: f32[128,128], index: 3, kind: input, shape index: {}]   ;;  %s985_s4 = inlined_call_operand.vmem [shape: f32[1,128], index: 4, kind: input, shape index: {}]   ;;  %s986_s5 = inlined_call_operand.hbm [shape: f32[128,128], index: 5, kind: input, shape index: {}]   ;;  %s987_s6 = inlined_call_operand.vmem [shape: f32[1,128], index: 6, kind: input, shape index: {}]   ;;  %s988_s7 = inlined_call_operand.hbm [shape: f32[128,128], index: 7, kind: input, shape index: {}]   ;;  %s989_s8 = inlined_call_operand.vmem [shape: f32[1,128], index: 8, kind: input, shape index: {}]   ;;  %s990_s9 = inlined_call_operand.hbm [shape: f32[8,128], index: 9, kind: output, shape index: {}]  }
   0x1   :  { %15 = vsyncpa [#allocation6], 0 }
   0x2   :  { %16 = vsyncpa [#allocation9], 0 }
   0x3   :  { %17 = vsyncpa [#allocation4], 0  ;;  %s808_s30 = smov [#allocation5]   ;;  %s809_s11 = smov [#allocation2]  }
   0x4   :  { %s39_s10 = sshll.u32 %s808_s30, 4  ;;  %s25_s12 = sshll.u32 %s809_s11, 4  ;;  %s40_s10 = int_to_ptr.vmem [resolvable:$true] %s39_s10  ;;  %s26_s12 = int_to_ptr.vmem [resolvable:$true] %s25_s12 }
   0x5   :  { %s708_s13 = scalar_lea.vmem %s40_s10, 2048  ;;  %p713_p1 = scmp.lt.s32.totalorder %s40_s10, %s40_s10 }
   0x6   :  { %p709_p0 = scmp.ne.s32.totalorder %s40_s10, %s708_s13  ;;  %p714_p2 = scmp.lt.s32.totalorder %s708_s13, %s708_s13 }
   0x8   :  { %p715_p3 = por %p714_p2, %p713_p1 }
   0xa   :  { %p716_p4 = pnand %p715_p3, %p709_p0 }
   0xc   :  { %719 = shalt.err (!%p716_p4)
}
   0xd   :  { %s810_s14 = smov 128   ;;  %s811_s15 = smov 8  }
   0xe   :  { %45 = dma.hbm_to_vmem [thread:$0]  %s984_s3, 2048, %s40_s10, [#allocation6], %s810_s14, %s810_s14, %s811_s15  }
   0xf   :  { %s728_s18 = scalar_lea.vmem %s26_s12, 2048  ;;  %p733_p6 = scmp.lt.s32.totalorder %s26_s12, %s26_s12 }
  0x10   :  { %p729_p5 = scmp.ne.s32.totalorder %s26_s12, %s728_s18  ;;  %p734_p7 = scmp.lt.s32.totalorder %s728_s18, %s728_s18 }
  0x12   :  { %p735_p8 = por %p734_p7, %p733_p6 }
  0x14   :  { %p736_p9 = pnand %p735_p8, %p729_p5 }
  0x16   :  { %739 = shalt.err (!%p736_p9)
}
  0x17   :  { %31 = dma.hbm_to_vmem [thread:$0]  %s982_s1, 2048, %s26_s12, [#allocation3], %s810_s14, %s810_s14, %s811_s15  }
  0x18   :  { %s812_s21 = smov [#allocation7]   ;;  %s813_s23 = smov [#allocation8]  }
  0x19   :  { %s53_s22 = sshll.u32 %s812_s21, 4  ;;  %s67_s24 = sshll.u32 %s813_s23, 4  ;;  %s54_s22 = int_to_ptr.vmem [resolvable:$true] %s53_s22  ;;  %s68_s24 = int_to_ptr.vmem [resolvable:$true] %s67_s24 }
  0x1a   :  { %s748_s3 = scalar_lea.vmem %s54_s22, 2048  ;;  %p753_p11 = scmp.lt.s32.totalorder %s54_s22, %s54_s22 }
  0x1b   :  { %p749_p10 = scmp.ne.s32.totalorder %s54_s22, %s748_s3  ;;  %p754_p12 = scmp.lt.s32.totalorder %s748_s3, %s748_s3 }
  0x1d   :  { %p755_p13 = por %p754_p12, %p753_p11 }
  0x1f   :  { %p756_p0 = pnand %p755_p13, %p749_p10 }
  0x21   :  { %759 = shalt.err (!%p756_p0)
}
  0x22   :  { %59 = dma.hbm_to_vmem [thread:$0]  %s986_s5, 2048, %s54_s22, [#allocation6], %s810_s14, %s810_s14, %s811_s15  }
  0x23   :  { %s768_s1 = scalar_lea.vmem %s68_s24, 2048  ;;  %p773_p2 = scmp.lt.s32.totalorder %s68_s24, %s68_s24 }
  0x24   :  { %p769_p1 = scmp.ne.s32.totalorder %s68_s24, %s768_s1  ;;  %p774_p3 = scmp.lt.s32.totalorder %s768_s1, %s768_s1 }
  0x26   :  { %p775_p4 = por %p774_p3, %p773_p2 }
  0x28   :  { %p776_p5 = pnand %p775_p4, %p769_p1 }
  0x2a   :  { %779 = shalt.err (!%p776_p5)
}
  0x2b   :  { %73 = dma.hbm_to_vmem [thread:$0]  %s988_s7, 2048, %s68_s24, [#allocation9], %s810_s14, %s810_s14, %s811_s15  }
  0x2c   :  { %800 = dma.done.wait [#allocation3], 2048  }
  0x2d   :  { %801 = vsyncadd [#allocation3], 4294965248 }
  0x2e   :  { %802 = dma.done.wait [#allocation6], 4096  }
  0x2f   :  { %803 = vsyncadd [#allocation6], 4294963200 }
  0x30   :  { %804 = dma.done.wait [#allocation9], 2048  }
  0x31   :  { %805 = vsyncadd [#allocation9], 4294965248  ;;  %v814_v0 = vmov 0.0   ;;  %vm815_vm0 = vmmov 0   ;;  %v104_v1 = vld [vmem:[#allocation2 + $0x78] sm:$0xff]  ;;  %v103_v2 = vld [vmem:[#allocation2 + $0x70] sm:$0xff] }
  0x32   :  { %551 = vmatprep.subr.mxu0 %v814_v0  ;;  %583 = vmatprep.mubr.msk.f32.mxu0 %vm815_vm0, %v814_v0  ;;  %v102_v3 = vld [vmem:[#allocation2 + $0x68] sm:$0xff]  ;;  %v101_v4 = vld [vmem:[#allocation2 + $0x60] sm:$0xff]  ;;  %v197_v5 = vld [vmem:[#allocation5 + $0x78] sm:$0xff]  ;;  %s816_s13 = smov [#allocation10]  }
  0x33   :  { %586 = vmatprep.subr.mxu1 %v814_v0  ;;  %618 = vmatprep.mubr.msk.f32.mxu1 %vm815_vm0, %v814_v0  ;;  %v100_v6 = vld [vmem:[#allocation2 + $0x58] sm:$0xff]  ;;  %v196_v7 = vld [vmem:[#allocation5 + $0x70] sm:$0xff]  ;;  %v195_v8 = vld [vmem:[#allocation5 + $0x68] sm:$0xff]  ;;  %s468_s14 = sshll.u32 %s816_s13, 4  ;;  %s469_s14 = int_to_ptr.vmem [resolvable:$true] %s468_s14 }
  0x34   :  { %552 = vmatpush3.msra.mxu0 %v104_v1  ;;  %587 = vmatpush3.msra.mxu1 %v197_v5  ;;  %v99_v9 = vld [vmem:[#allocation2 + $0x50] sm:$0xff]  ;;  %v194_v10 = vld [vmem:[#allocation5 + $0x60] sm:$0xff]  ;;  %v98_v11 = vld [vmem:[#allocation2 + $0x48] sm:$0xff]  ;;  %s780_s15 = scalar_lea.vmem %s469_s14, 128  ;;  %p785_p7 = scmp.lt.s32.totalorder %s469_s14, %s469_s14 }
  0x35   :  { %553 = vmatprep.subr.mxu0 %v814_v0  ;;  %588 = vmatprep.subr.mxu1 %v814_v0  ;;  %v193_v12 = vld [vmem:[#allocation5 + $0x58] sm:$0xff]  ;;  %v97_v13 = vld [vmem:[#allocation2 + $0x40] sm:$0xff]  ;;  %v192_v14 = vld [vmem:[#allocation5 + $0x50] sm:$0xff]  ;;  %p781_p6 = scmp.ne.s32.totalorder %s469_s14, %s780_s15  ;;  %p786_p8 = scmp.lt.s32.totalorder %s780_s15, %s780_s15 }
  0x36   :  { %554 = vmatpush3.msra.mxu0 %v103_v2  ;;  %589 = vmatpush3.msra.mxu1 %v196_v7  ;;  %v96_v15 = vld [vmem:[#allocation2 + $0x38] sm:$0xff]  ;;  %v191_v16 = vld [vmem:[#allocation5 + $0x48] sm:$0xff]  ;;  %v95_v17 = vld [vmem:[#allocation2 + $0x30] sm:$0xff] }
  0x37   :  { %555 = vmatprep.subr.mxu0 %v814_v0  ;;  %590 = vmatprep.subr.mxu1 %v814_v0  ;;  %v190_v18 = vld [vmem:[#allocation5 + $0x40] sm:$0xff]  ;;  %v94_v19 = vld [vmem:[#allocation2 + $0x28] sm:$0xff]  ;;  %v189_v20 = vld [vmem:[#allocation5 + $0x38] sm:$0xff]  ;;  %p787_p9 = por %p786_p8, %p785_p7 }
  0x38   :  { %556 = vmatpush3.msra.mxu0 %v102_v3  ;;  %591 = vmatpush3.msra.mxu1 %v195_v8  ;;  %v93_v21 = vld [vmem:[#allocation2 + $0x20] sm:$0xff]  ;;  %v188_v22 = vld [vmem:[#allocation5 + $0x30] sm:$0xff]  ;;  %v92_v23 = vld [vmem:[#allocation2 + $0x18] sm:$0xff] }
  0x39   :  { %557 = vmatprep.subr.mxu0 %v814_v0  ;;  %592 = vmatprep.subr.mxu1 %v814_v0  ;;  %v187_v24 = vld [vmem:[#allocation5 + $0x28] sm:$0xff]  ;;  %v91_v25 = vld [vmem:[#allocation2 + $0x10] sm:$0xff]  ;;  %v186_v26 = vld [vmem:[#allocation5 + $0x20] sm:$0xff]  ;;  %p788_p10 = pnand %p787_p9, %p781_p6 }
  0x3a   :  { %558 = vmatpush3.msra.mxu0 %v101_v4  ;;  %593 = vmatpush3.msra.mxu1 %v194_v10  ;;  %v90_v27 = vld [vmem:[#allocation2 + $0x8] sm:$0xff]  ;;  %v185_v28 = vld [vmem:[#allocation5 + $0x18] sm:$0xff]  ;;  %v89_v29 = vld [vmem:[#allocation2] sm:$0xff] }
  0x3b   :  { %559 = vmatprep.subr.mxu0 %v814_v0  ;;  %594 = vmatprep.subr.mxu1 %v814_v0  ;;  %v88_v30 = vld [vmem:[%s981_s0] sm:$0xff]  ;;  %v184_v31 = vld [vmem:[#allocation5 + $0x10] sm:$0xff]  ;;  %v183_v32 = vld [vmem:[#allocation5 + $0x8] sm:$0xff] }
  0x3c   :  { %560 = vmatpush3.msra.mxu0 %v100_v6  ;;  %595 = vmatpush3.msra.mxu1 %v193_v12  ;;  %v182_v33 = vld [vmem:[#allocation5] sm:$0xff]  ;;  %v290_v34 = vld [vmem:[#allocation7 + $0x78] sm:$0xff]  ;;  %v289_v35 = vld [vmem:[#allocation7 + $0x70] sm:$0xff] }
  0x3d   :  { %561 = vmatprep.subr.mxu0 %v814_v0  ;;  %596 = vmatprep.subr.mxu1 %v814_v0  ;;  %v288_v36 = vld [vmem:[#allocation7 + $0x68] sm:$0xff]  ;;  %v287_v37 = vld [vmem:[#allocation7 + $0x60] sm:$0xff]  ;;  %v286_v38 = vld [vmem:[#allocation7 + $0x58] sm:$0xff] }
  0x3e   :  { %562 = vmatpush3.msra.mxu0 %v99_v9  ;;  %597 = vmatpush3.msra.mxu1 %v192_v14  ;;  %v285_v39 = vld [vmem:[#allocation7 + $0x50] sm:$0xff]  ;;  %v284_v40 = vld [vmem:[#allocation7 + $0x48] sm:$0xff]  ;;  %v283_v41 = vld [vmem:[#allocation7 + $0x40] sm:$0xff] }
  0x3f   :  { %563 = vmatprep.subr.mxu0 %v814_v0  ;;  %598 = vmatprep.subr.mxu1 %v814_v0  ;;  %v282_v42 = vld [vmem:[#allocation7 + $0x38] sm:$0xff]  ;;  %v281_v43 = vld [vmem:[#allocation7 + $0x30] sm:$0xff]  ;;  %v280_v44 = vld [vmem:[#allocation7 + $0x28] sm:$0xff] }
  0x40   :  { %564 = vmatpush3.msra.mxu0 %v98_v11  ;;  %599 = vmatpush3.msra.mxu1 %v191_v16  ;;  %v279_v45 = vld [vmem:[#allocation7 + $0x20] sm:$0xff]  ;;  %v278_v46 = vld [vmem:[#allocation7 + $0x18] sm:$0xff]  ;;  %v277_v47 = vld [vmem:[#allocation7 + $0x10] sm:$0xff] }
  0x41   :  { %565 = vmatprep.subr.mxu0 %v814_v0  ;;  %600 = vmatprep.subr.mxu1 %v814_v0  ;;  %v479_v48 = vld [vmem:[%s983_s2] ss:$0 sm:$0xff]  ;;  %v276_v52 = vld [vmem:[#allocation7 + $0x8] sm:$0xff]  ;;  %v383_v54 = vld [vmem:[#allocation8 + $0x78] sm:$0xff] }
  0x42   :  { %566 = vmatpush3.msra.mxu0 %v97_v13  ;;  %601 = vmatpush3.msra.mxu1 %v190_v18  ;;  %v275_v53 = vld [vmem:[#allocation7] sm:$0xff]  ;;  %v382_v55 = vld [vmem:[#allocation8 + $0x70] sm:$0xff]  ;;  %v381_v56 = vld [vmem:[#allocation8 + $0x68] sm:$0xff] }
  0x43   :  { %567 = vmatprep.subr.mxu0 %v814_v0  ;;  %602 = vmatprep.subr.mxu1 %v814_v0  ;;  %v380_v57 = vld [vmem:[#allocation8 + $0x60] sm:$0xff]  ;;  %v379_v58 = vld [vmem:[#allocation8 + $0x58] sm:$0xff]  ;;  %v378_v59 = vld [vmem:[#allocation8 + $0x50] sm:$0xff] }
  0x44   :  { %568 = vmatpush3.msra.mxu0 %v96_v15  ;;  %603 = vmatpush3.msra.mxu1 %v189_v20  ;;  %v377_v60 = vld [vmem:[#allocation8 + $0x48] sm:$0xff]  ;;  %v376_v61 = vld [vmem:[#allocation8 + $0x40] sm:$0xff]  ;;  %v375_v62 = vld [vmem:[#allocation8 + $0x38] sm:$0xff] }
  0x45   :  { %569 = vmatprep.subr.mxu0 %v814_v0  ;;  %604 = vmatprep.subr.mxu1 %v814_v0  ;;  %v374_v63 = vld [vmem:[#allocation8 + $0x30] sm:$0xff]  ;;  %v373_v1 = vld [vmem:[#allocation8 + $0x28] sm:$0xff]  ;;  %v372_v2 = vld [vmem:[#allocation8 + $0x20] sm:$0xff] }
  0x46   :  { %570 = vmatpush3.msra.mxu0 %v95_v17  ;;  %605 = vmatpush3.msra.mxu1 %v188_v22  ;;  %v371_v3 = vld [vmem:[#allocation8 + $0x18] sm:$0xff]  ;;  %v370_v4 = vld [vmem:[#allocation8 + $0x10] sm:$0xff]  ;;  %v480_v5 = vld [vmem:[%s985_s4] ss:$0 sm:$0xff] }
  0x47   :  { %571 = vmatprep.subr.mxu0 %v814_v0  ;;  %606 = vmatprep.subr.mxu1 %v814_v0  ;;  %v369_v9 = vld [vmem:[#allocation8 + $0x8] sm:$0xff]  ;;  %v368_v10 = vld [vmem:[#allocation8] sm:$0xff] }
  0x48   :  { %572 = vmatpush3.msra.mxu0 %v94_v19  ;;  %607 = vmatpush3.msra.mxu1 %v187_v24  ;;  %v481_v11 = vld [vmem:[%s987_s6] ss:$0 sm:$0xff] }
  0x49   :  { %573 = vmatprep.subr.mxu0 %v814_v0  ;;  %608 = vmatprep.subr.mxu1 %v814_v0  ;;  %v482_v15 = vld [vmem:[%s989_s8] ss:$0 sm:$0xff] }
  0x4a   :  { %574 = vmatpush3.msra.mxu0 %v93_v21  ;;  %609 = vmatpush3.msra.mxu1 %v186_v26 }
  0x4b   :  { %575 = vmatprep.subr.mxu0 %v814_v0  ;;  %610 = vmatprep.subr.mxu1 %v814_v0 }
  0x4c   :  { %576 = vmatpush3.msra.mxu0 %v92_v23  ;;  %611 = vmatpush3.msra.mxu1 %v185_v28 }
  0x4d   :  { %577 = vmatprep.subr.mxu0 %v814_v0  ;;  %612 = vmatprep.subr.mxu1 %v814_v0 }
  0x4e   :  { %578 = vmatpush3.msra.mxu0 %v91_v25  ;;  %613 = vmatpush3.msra.mxu1 %v184_v31 }
  0x4f   :  { %579 = vmatprep.subr.mxu0 %v814_v0  ;;  %614 = vmatprep.subr.mxu1 %v814_v0 }
  0x50   :  { %580 = vmatpush3.msra.mxu0 %v90_v27  ;;  %615 = vmatpush3.msra.mxu1 %v183_v32 }
  0x51   :  { %581 = vmatprep.subr.mxu0 %v814_v0  ;;  %616 = vmatprep.subr.mxu1 %v814_v0 }
  0x52   :  { %582 = vmatpush3.msra.mxu0 %v89_v29  ;;  %617 = vmatpush3.msra.mxu1 %v182_v33 }
  0x53   :  { %584 = vmatmul.mubr.f32.vlgmr.msra.gmra.mxu0 %v88_v30  ;;  %621 = vmatprep.subr.mxu0 %v814_v0 }
  0x54   :  { %653 = vmatprep.mubr.msk.f32.mxu0 %vm815_vm0, %v814_v0  ;;  %656 = vmatprep.subr.mxu1 %v814_v0 }
  0x55   :  { %622 = vmatpush3.msra.mxu0 %v290_v34 }
  0x56   :  { %623 = vmatprep.subr.mxu0 %v814_v0 }
  0x57   :  { %624 = vmatpush3.msra.mxu0 %v289_v35 }
  0x58   :  { %625 = vmatprep.subr.mxu0 %v814_v0 }
  0x59   :  { %626 = vmatpush3.msra.mxu0 %v288_v36 }
  0x5a   :  { %627 = vmatprep.subr.mxu0 %v814_v0 }
  0x5b   :  { %628 = vmatpush3.msra.mxu0 %v287_v37 }
  0x5c   :  { %629 = vmatprep.subr.mxu0 %v814_v0 }
  0x5d   :  { %630 = vmatpush3.msra.mxu0 %v286_v38 }
  0x5e   :  { %631 = vmatprep.subr.mxu0 %v814_v0 }
  0x5f   :  { %632 = vmatpush3.msra.mxu0 %v285_v39 }
  0x60   :  { %633 = vmatprep.subr.mxu0 %v814_v0 }
  0x61   :  { %634 = vmatpush3.msra.mxu0 %v284_v40 }
  0x62   :  { %635 = vmatprep.subr.mxu0 %v814_v0 }
  0x63   :  { %636 = vmatpush3.msra.mxu0 %v283_v41 }
  0x64   :  { %637 = vmatprep.subr.mxu0 %v814_v0 }
  0x65   :  { %638 = vmatpush3.msra.mxu0 %v282_v42 }
  0x66   :  { %639 = vmatprep.subr.mxu0 %v814_v0 }
  0x67   :  { %640 = vmatpush3.msra.mxu0 %v281_v43 }
  0x68   :  { %641 = vmatprep.subr.mxu0 %v814_v0 }
  0x69   :  { %642 = vmatpush3.msra.mxu0 %v280_v44 }
  0x6a   :  { %643 = vmatprep.subr.mxu0 %v814_v0 }
  0x6b   :  { %644 = vmatpush3.msra.mxu0 %v279_v45 }
  0x6c   :  { %645 = vmatprep.subr.mxu0 %v814_v0 }
  0x6d   :  { %646 = vmatpush3.msra.mxu0 %v278_v46 }
  0x6e   :  { %647 = vmatprep.subr.mxu0 %v814_v0 }
  0x6f   :  { %648 = vmatpush3.msra.mxu0 %v277_v47 }
  0x70   :  { %649 = vmatprep.subr.mxu0 %v814_v0 }
  0x71   :  { %650 = vmatpush3.msra.mxu0 %v276_v52 }
  0x72   :  { %651 = vmatprep.subr.mxu0 %v814_v0 }
  0x73   :  { %652 = vmatpush3.msra.mxu0 %v275_v53 }
 0x113   :  { %v178_v49 = vpop.f32.mrf.mxu0 }
 0x114   :  { %v179_v50 = vadd.f32 %v479_v48, %v178_v49 }
 0x115   :  { %v585_v51 = vpop.f32.mrf.mxu0 }
 0x116   :  { %619 = vmatmul.mubr.f32.vlgmr.msra.gmra.mxu1 %v179_v50 }
 0x117   :  { %688 = vmatprep.mubr.msk.f32.mxu1 %vm815_vm0, %v814_v0  ;;  %657 = vmatpush3.msra.mxu1 %v383_v54 }
 0x118   :  { %658 = vmatprep.subr.mxu1 %v814_v0 }
 0x119   :  { %659 = vmatpush3.msra.mxu1 %v382_v55 }
 0x11a   :  { %660 = vmatprep.subr.mxu1 %v814_v0 }
 0x11b   :  { %661 = vmatpush3.msra.mxu1 %v381_v56 }
 0x11c   :  { %662 = vmatprep.subr.mxu1 %v814_v0 }
 0x11d   :  { %663 = vmatpush3.msra.mxu1 %v380_v57 }
 0x11e   :  { %664 = vmatprep.subr.mxu1 %v814_v0 }
 0x11f   :  { %665 = vmatpush3.msra.mxu1 %v379_v58 }
 0x120   :  { %666 = vmatprep.subr.mxu1 %v814_v0 }
 0x121   :  { %667 = vmatpush3.msra.mxu1 %v378_v59 }
 0x122   :  { %668 = vmatprep.subr.mxu1 %v814_v0 }
 0x123   :  { %669 = vmatpush3.msra.mxu1 %v377_v60 }
 0x124   :  { %670 = vmatprep.subr.mxu1 %v814_v0 }
 0x125   :  { %671 = vmatpush3.msra.mxu1 %v376_v61 }
 0x126   :  { %672 = vmatprep.subr.mxu1 %v814_v0 }
 0x127   :  { %673 = vmatpush3.msra.mxu1 %v375_v62 }
 0x128   :  { %674 = vmatprep.subr.mxu1 %v814_v0 }
 0x129   :  { %675 = vmatpush3.msra.mxu1 %v374_v63 }
 0x12a   :  { %676 = vmatprep.subr.mxu1 %v814_v0 }
 0x12b   :  { %677 = vmatpush3.msra.mxu1 %v373_v1 }
 0x12c   :  { %678 = vmatprep.subr.mxu1 %v814_v0 }
 0x12d   :  { %679 = vmatpush3.msra.mxu1 %v372_v2 }
 0x12e   :  { %680 = vmatprep.subr.mxu1 %v814_v0 }
 0x12f   :  { %681 = vmatpush3.msra.mxu1 %v371_v3 }
 0x130   :  { %682 = vmatprep.subr.mxu1 %v814_v0 }
 0x131   :  { %683 = vmatpush3.msra.mxu1 %v370_v4 }
 0x132   :  { %684 = vmatprep.subr.mxu1 %v814_v0 }
 0x133   :  { %685 = vmatpush3.msra.mxu1 %v369_v9 }
 0x134   :  { %686 = vmatprep.subr.mxu1 %v814_v0 }
 0x135   :  { %687 = vmatpush3.msra.mxu1 %v368_v10 }
 0x1d6   :  { %v271_v6 = vpop.f32.mrf.mxu1 }
 0x1d7   :  { %v272_v7 = vadd.f32 %v480_v5, %v271_v6 }
 0x1d8   :  { %v620_v8 = vpop.f32.mrf.mxu1 }
 0x1d9   :  { %654 = vmatmul.mubr.f32.vlgmr.msra.gmra.mxu0 %v272_v7 }
 0x299   :  { %v364_v12 = vpop.f32.mrf.mxu0 }
 0x29a   :  { %v365_v13 = vadd.f32 %v481_v11, %v364_v12 }
 0x29b   :  { %v655_v14 = vpop.f32.mrf.mxu0 }
 0x29c   :  { %689 = vmatmul.mubr.f32.vlgmr.msra.gmra.mxu1 %v365_v13 }
 0x35c   :  { %v457_v16 = vpop.f32.mrf.mxu1 }
 0x35d   :  { %v458_v17 = vadd.f32 %v482_v15, %v457_v16 }
 0x35e   :  { %v690_v0 = vpop.f32.mrf.mxu1 }
 0x35f   :  { %461 = vst [vmem:[#allocation10] sm:$0xff] %v458_v17 }
 0x360   :  { %791 = shalt.err (!%p788_p10)
}
 0x361   :  { %471 = dma.vmem_to_hbm [thread:$0]  %s469_s14, 128, %s990_s9, [#allocation4]  }
 0x362   :  { %806 = dma.done.wait [#allocation4], 128  }
 0x363   :  { %807 = vsyncadd [#allocation4], 4294967168 }
 0x364   :  { %475 = vsyncpa [#allocation3], 1 }
 0x365   :  { %476 = vsyncpa [#allocation6], 1 }
 0x366   :  { %477 = vsyncpa [#allocation9], 1 }
 0x367   :  { %478 = vsyncpa [#allocation4], 1 }

</bundles_post_ra>
